<compile_context>
chip_gen: v6e
topology: v6e:2x2x1
jax: 0.10.0
libtpu: 0.0.40
codegen_flags: <defaults>
</compile_context>

<pallas_src>
import jax
import jax.numpy as jnp
import numpy as np
from jax.experimental import pallas as pl
from jax.experimental.pallas import tpu as pltpu


def _copy_kernel(x_ref, o_ref):
    # Whole forward pass of NoPresparseNormalizer: pass the tile through.
    o_ref[...] = x_ref[...]


# Max rows of a (rows, 128) f32 tile kept at 4096 -> 2 MiB per buffer.
# With double-buffered input + output that is ~8 MiB of VMEM: safe on
# v5e/v6e (128 MiB) and v7x (64 MiB) alike, while still far above the
# 512–2048-row range where the copy reaches >85% of HBM roofline.
_MAX_TILE_ROWS = 4096


def _materialized_identity_copy(x):
    """Explicit HBM read + HBM write copy of x via a Pallas kernel."""
    total = int(np.prod(x.shape))
    itemsize = jnp.dtype(x.dtype).itemsize
    bytes_accessed = 2 * total * itemsize
    cost = pl.CostEstimate(flops=0, transcendentals=0, bytes_accessed=bytes_accessed)

    if total >= 128 and total % 128 == 0:
        # Lane-dense slab: last dim exactly 128 -> unmasked vector stores.
        rows = total // 128
        x2 = x.reshape(rows, 128)
        tile_rows = rows if rows <= _MAX_TILE_ROWS else _MAX_TILE_ROWS
        grid = (pl.cdiv(rows, tile_rows),)

        y2 = pl.pallas_call(
            _copy_kernel,
            out_shape=jax.ShapeDtypeStruct((rows, 128), x.dtype),
            grid_spec=pltpu.PrefetchScalarGridSpec(
                num_scalar_prefetch=0,
                grid=grid,
                in_specs=[pl.BlockSpec((tile_rows, 128), lambda i: (i, 0))],
                out_specs=pl.BlockSpec((tile_rows, 128), lambda i: (i, 0)),
            ),
            compiler_params=pltpu.CompilerParams(
                dimension_semantics=("parallel",),
                vmem_limit_bytes=64 * 1024 * 1024,
            ),
            cost_estimate=cost,
        )(x2)
        return y2.reshape(x.shape)

    # Small / non-128-divisible fallback: copy the whole array as one block.
    return pl.pallas_call(
        _copy_kernel,
        out_shape=jax.ShapeDtypeStruct(x.shape, x.dtype),
        cost_estimate=cost,
    )(x)


def no_presparse_normalizer(x, num_motifs=None, affine=False, materialize=False):
    """JAX/Pallas equivalent of NoPresparseNormalizer.forward.

    `num_motifs` / `affine` are accepted for interface parity (the PyTorch
    module stores num_motifs but uses no parameters in forward).

    Default (materialize=False): identity — return x with no kernel launch and
    no HBM traffic, which is the fastest possible implementation of this module
    on every TPU generation.  Set materialize=True to force a fresh output
    buffer via the optimized Pallas copy kernel.
    """
    if num_motifs is not None:
        assert x.shape[1] == num_motifs, "channel axis must equal num_motifs"

    if not materialize:
        return x
    return _materialized_identity_copy(x)


if __name__ == "__main__":
    key = jax.random.PRNGKey(0)
    batch, num_motifs, seq_len = 2, 4, 16  # (N, C=num_motifs, L)
    x = jax.random.normal(key, (batch, num_motifs, seq_len), dtype=jnp.float32)

    # Fast path: exact identity, no kernel.
    y_fast = no_presparse_normalizer(x, num_motifs=num_motifs, affine=False)
    y_fast = jax.block_until_ready(y_fast)
    assert y_fast.shape == x.shape and y_fast.dtype == x.dtype
    assert bool(jnp.array_equal(y_fast, x))

    # Materialized path: exercises the lane-dense Pallas copy kernel once.
    y_copy = no_presparse_normalizer(
        x, num_motifs=num_motifs, affine=False, materialize=True
    )
    y_copy = jax.block_until_ready(y_copy)
    assert y_copy.shape == x.shape and y_copy.dtype == x.dtype
    assert bool(jnp.array_equal(y_copy, x))

    print("KERNEL_OK")
</pallas_src>

<mosaic_0001>
module attributes {stable_mosaic.version = 11 : i64} {
  func.func @_copy_kernel(%arg0: i32, %arg1: memref<1x128xf32, #tpu.memory_space<vmem>>, %arg2: memref<1x128xf32, #tpu.memory_space<vmem>>) attributes {dimension_semantics = [#tpu.dimension_semantics<parallel>], iteration_bounds = array<i64: 1>, scalar_prefetch = 0 : i64, scratch_operands = 0 : i64, tpu.core_type = #tpu.core_type<tc>, window_params = [{transform_indices = @transform_0, window_bounds = array<i64: 1, 128>}, {transform_indices = @transform_1, window_bounds = array<i64: 1, 128>}]} {
    %c0 = arith.constant 0 : index
    %c0_0 = arith.constant 0 : index
    %0 = vector.load %arg1[%c0, %c0_0] : memref<1x128xf32, #tpu.memory_space<vmem>>, vector<1x128xf32>
    %c0_1 = arith.constant 0 : index
    %c0_2 = arith.constant 0 : index
    %1 = vector.load %arg2[%c0_1, %c0_2] : memref<1x128xf32, #tpu.memory_space<vmem>>, vector<1x128xf32>
    tpu.vector_store %arg2[%c0_1, %c0_2], %0 {strides = array<i32>} : memref<1x128xf32, #tpu.memory_space<vmem>>, vector<1x128xf32>,
    return
  }
  func.func @transform_0(%arg0: i32) -> (i32, i32) {
    %c0_i32 = arith.constant 0 : i32
    %c0_i32_0 = arith.constant 0 : i32
    return %arg0, %c0_i32 : i32, i32
  }
  func.func @transform_1(%arg0: i32) -> (i32, i32) {
    %c0_i32 = arith.constant 0 : i32
    %c0_i32_0 = arith.constant 0 : i32
    return %arg0, %c0_i32 : i32, i32
  }
}

</mosaic_0001>

<bundles_post_ra>
// kernel: tpu_custom_call.1
= control target key start
LH: loop header
LB: loop body
LE: loop exit
PB: predicated region body
PF: predicated region fallthrough
CT: control target
= control target key end

     0   :  { %6 = vsyncpa [#allocation3], 0  ;;  %s102_s0 = inlined_call_operand.hbm [shape: f32[1,128], index: 0, kind: input, shape index: {}]   ;;  %s103_s1 = inlined_call_operand.hbm [shape: f32[1,128], index: 1, kind: output, shape index: {}]  }
   0x1   :  { %7 = vsyncpa [#allocation4], 0  ;;  %s84_s6 = smov [#allocation2]  }
   0x2   :  { %s14_s7 = sshll.u32 %s84_s6, 4  ;;  %s15_s7 = int_to_ptr.vmem [resolvable:$true] %s14_s7 }
   0x3   :  { %s48_s8 = scalar_lea.vmem %s15_s7, 16  ;;  %s52_s9 = scalar_lea.vmem %s15_s7, 32 }
   0x4   :  { %p49_p0 = scmp.ne.s32.totalorder %s15_s7, %s48_s8  ;;  %p53_p1 = scmp.lt.s32.totalorder %s15_s7, %s15_s7 }
   0x5   :  { %p54_p2 = scmp.lt.s32.totalorder %s52_s9, %s48_s8 }
   0x7   :  { %p55_p3 = por %p54_p2, %p53_p1 }
   0x9   :  { %p56_p4 = pnand %p55_p3, %p49_p0 }
   0xb   :  { %59 = shalt.err (!%p56_p4)
}
   0xc   :  { %17 = dma.hbm_to_vmem [thread:$0]  %s102_s0, 16, %s15_s7, [#allocation3]  }
   0xd   :  { %80 = dma.done.wait [#allocation3], 16  }
   0xe   :  { %81 = vsyncadd [#allocation3], 4294967280  ;;  %s85_s12 = smov [#allocation5]   ;;  %v21_v0 = vld [vmem:[#allocation2] sm:$0x1] }
   0xf   :  { %s29_s13 = sshll.u32 %s85_s12, 4  ;;  %22 = vst [vmem:[#allocation5] sm:$0x1] %v21_v0  ;;  %s30_s13 = int_to_ptr.vmem [resolvable:$true] %s29_s13 }
  0x10   :  { %s60_s14 = scalar_lea.vmem %s30_s13, 16  ;;  %s64_s15 = scalar_lea.vmem %s30_s13, 32 }
  0x11   :  { %p61_p5 = scmp.ne.s32.totalorder %s30_s13, %s60_s14  ;;  %p65_p6 = scmp.lt.s32.totalorder %s30_s13, %s30_s13 }
  0x12   :  { %p66_p7 = scmp.lt.s32.totalorder %s64_s15, %s60_s14 }
  0x14   :  { %p67_p8 = por %p66_p7, %p65_p6 }
  0x16   :  { %p68_p9 = pnand %p67_p8, %p61_p5 }
  0x18   :  { %71 = shalt.err (!%p68_p9)
}
  0x19   :  { %32 = dma.vmem_to_hbm [thread:$0]  %s30_s13, 16, %s103_s1, [#allocation4]  }
  0x1a   :  { %82 = dma.done.wait [#allocation4], 16  }
  0x1b   :  { %83 = vsyncadd [#allocation4], 4294967280 }
  0x1c   :  { %36 = vsyncpa [#allocation3], 1 }
  0x1d   :  { %37 = vsyncpa [#allocation4], 1 }

</bundles_post_ra>
